<compile_context>
chip_gen: v7x
topology: tpu7x:2x2x1
jax: 0.10.0
libtpu: 0.0.40
codegen_flags: <defaults>
</compile_context>

<pallas_src>
import jax
import jax.numpy as jnp
from jax.experimental import pallas as pl
from jax.experimental.pallas import tpu as pltpu

FEAT_PAD = 128        # stand-in for resnet.fc.in_features (2048); multiple of 128 -> lane-dense
WORD_DIME = 32        # args['word_dime'] (logical output width)
WORD_PAD = 128        # lane-padded word dim; wrapper slices back to WORD_DIME
BN_EPS = 1e-5         # torch.nn.BatchNorm1d default eps
MAX_BATCH_BLOCK = 32  # images per trunk grid step (raised from 8 per perf review)


def trunk_kernel(x_ref, cwt_ref, cb_ref, feat_ref):
    """Synthetic frozen trunk: relu(W^T x + b) -> global average pool over HW.

    x_ref:    (b_blk, C, HW)    f32/bf16  NCHW slab for this batch block (HW lane-dense)
    cwt_ref:  (FEAT_PAD, C)     bf16      transposed 1x1-conv weight (natural MXU operand)
    cb_ref:   (FEAT_PAD, 1)     f32       trunk bias
    feat_ref: (b_blk, FEAT_PAD) bf16      pooled features for this block (row-major, lane-dense)
    """
    b_blk, _, hw = x_ref.shape

    # Hoisted loop invariants (loaded / broadcast once per grid step, not once per image).
    cwt = cwt_ref[...]                                              # (FEAT_PAD, C) bf16
    cb_b = jnp.broadcast_to(cb_ref[...], (FEAT_PAD, hw))            # lane-broadcast, hoisted
    # Pooling operand for the MXU: 8 identical ones-rows (8 = sublane tile height, avoids a
    # degenerate 1-row matmul operand); row 0 of the product is used.
    pool_ones = jnp.full((8, hw), 1.0, dtype=jnp.bfloat16)
    inv_hw = 1.0 / hw

    def body(b, carry):
        xb = x_ref[b].astype(jnp.bfloat16)                          # (C, HW), lane-dense
        # 1x1 "conv" as a channel matmul: natural (M,K)x(K,N) MXU form, K = C (tiny).
        yb = jnp.dot(cwt, xb, preferred_element_type=jnp.float32)   # (FEAT_PAD, HW) f32
        yb = jnp.maximum(yb + cb_b, 0.0)                            # bias + ReLU (f32 VPU)
        # Global average pool on the MXU (contract-last-dims, same pattern as q @ k^T):
        # (8, HW) x (FEAT_PAD, HW)^T -> (8, FEAT_PAD).  The pooled vector comes out as a
        # lane-dense row, so no sublane->lane transpose and no concat (old XLU hot spot).
        p8 = jax.lax.dot_general(
            pool_ones, yb.astype(jnp.bfloat16),
            dimension_numbers=(((1,), (1,)), ((), ())),
            preferred_element_type=jnp.float32)                     # (8, FEAT_PAD) f32
        pooled = p8[0:1, :] * inv_hw                                # (1, FEAT_PAD) f32
        feat_ref[pl.ds(b, 1), :] = pooled.astype(jnp.bfloat16)      # bf16 feats (halved traffic)
        return carry

    # fori_loop bounds the live set (vs. the old 8-wide static Python unroll); small unroll
    # keeps back-to-back vmatmuls visible to the scheduler.
    jax.lax.fori_loop(0, b_blk, body, 0, unroll=min(4, b_blk))


def head_kernel(f_ref, lw_ref, lb_ref, g_ref, bt_ref, o_ref):
    """Trainable head: Linear(FEAT_PAD -> WORD_PAD) + BatchNorm1d (training-mode stats)."""
    feats = f_ref[...]                                              # (B, FEAT_PAD) bf16
    y = jnp.dot(feats, lw_ref[...], preferred_element_type=jnp.float32)
    y = y + lb_ref[...]                                             # (B, WORD_PAD) f32
    mean = jnp.mean(y, axis=0, keepdims=True)                       # batch mean
    var = jnp.mean(jnp.square(y - mean), axis=0, keepdims=True)     # biased batch variance
    inv = jax.lax.rsqrt(var + BN_EPS)                               # EUP
    o_ref[...] = (y - mean) * inv * g_ref[...] + bt_ref[...]


def _batch_block(batch):
    """Images per trunk grid step: as large as possible (<= MAX_BATCH_BLOCK), a divisor of
    the batch (every block full), and sublane-aligned (multiple of 8) or the full batch so
    the (b_blk, FEAT_PAD) output block stays layout-legal with unmasked tile stores."""
    if batch <= MAX_BATCH_BLOCK:
        return batch
    for cand in range(MAX_BATCH_BLOCK, 7, -1):
        if cand % 8 == 0 and batch % cand == 0:
            return cand
    return batch  # fallback: whole batch in one step (always legal, just less parallel)


def encoder_cnn_forward(images, params):
    """images: (B, C, H, W) NCHW float (f32, or bf16 if the caller has it for free).
    Returns (B, WORD_DIME) float32."""
    B, C, H, W = images.shape
    HW = H * W
    # Free metadata reshape only -- no NCHW->NHWC transpose pass and no dtype pass over HBM.
    x = images.reshape(B, C, HW)

    b_blk = _batch_block(B)
    n_blocks = B // b_blk

    # ---- kernel 1: trunk, grid-parallel over batch blocks (both TCs on v7x megacore) ----
    feats = pl.pallas_call(
        trunk_kernel,
        out_shape=jax.ShapeDtypeStruct((B, FEAT_PAD), jnp.bfloat16),
        grid_spec=pltpu.PrefetchScalarGridSpec(
            num_scalar_prefetch=0,
            grid=(n_blocks,),
            in_specs=[
                pl.BlockSpec((b_blk, C, HW), lambda i: (i, 0, 0)),     # activations
                pl.BlockSpec((FEAT_PAD, C), lambda i: (0, 0)),         # conv W^T (resident)
                pl.BlockSpec((FEAT_PAD, 1), lambda i: (0, 0)),         # conv bias (resident)
            ],
            out_specs=pl.BlockSpec((b_blk, FEAT_PAD), lambda i: (i, 0)),
        ),
        compiler_params=pltpu.CompilerParams(
            dimension_semantics=("parallel",),   # batch blocks are independent
        ),
    )(x, params["conv_wt"], params["conv_b"])

    # ---- kernel 2: head (needs full-batch BN statistics), one tiny single-step call ----
    out_pad = pl.pallas_call(
        head_kernel,
        out_shape=jax.ShapeDtypeStruct((B, WORD_PAD), jnp.float32),
        grid_spec=pltpu.PrefetchScalarGridSpec(
            num_scalar_prefetch=0,
            grid=(1,),
            in_specs=[
                pl.BlockSpec((B, FEAT_PAD), lambda i: (0, 0)),         # pooled feats (bf16)
                pl.BlockSpec((FEAT_PAD, WORD_PAD), lambda i: (0, 0)),  # linear W
                pl.BlockSpec((1, WORD_PAD), lambda i: (0, 0)),         # linear b
                pl.BlockSpec((1, WORD_PAD), lambda i: (0, 0)),         # bn gamma
                pl.BlockSpec((1, WORD_PAD), lambda i: (0, 0)),         # bn beta
            ],
            out_specs=pl.BlockSpec((B, WORD_PAD), lambda i: (0, 0)),
        ),
        compiler_params=pltpu.CompilerParams(
            dimension_semantics=("arbitrary",),
        ),
    )(feats, params["lin_w"], params["lin_b"], params["bn_gamma"], params["bn_beta"])

    # Drop the lane padding: logical word_dime columns only.
    return out_pad[:, :WORD_DIME]


def encoder_cnn_reference(images, params):
    """Pure-JAX mirror of the kernels (same bf16 casts) for tolerance checking."""
    B, C, H, W = images.shape
    HW = H * W
    x = images.reshape(B, C, HW).astype(jnp.bfloat16)
    y = jnp.einsum('fc,bch->bfh', params["conv_wt"], x,
                   preferred_element_type=jnp.float32)
    y = jnp.maximum(y + params["conv_b"][None, :, :], 0.0)
    pooled = jnp.einsum('bfh,h->bf', y.astype(jnp.bfloat16),
                        jnp.ones((HW,), jnp.bfloat16),
                        preferred_element_type=jnp.float32) * (1.0 / HW)
    feats = pooled.astype(jnp.bfloat16)
    z = jnp.dot(feats, params["lin_w"], preferred_element_type=jnp.float32) + params["lin_b"]
    mean = jnp.mean(z, axis=0, keepdims=True)
    var = jnp.mean(jnp.square(z - mean), axis=0, keepdims=True)
    out = (z - mean) * jax.lax.rsqrt(var + BN_EPS) * params["bn_gamma"] + params["bn_beta"]
    return out[:, :WORD_DIME]


def init_params(key, in_channels):
    k1, k2, k3, k4 = jax.random.split(key, 4)
    conv_wt = jax.random.normal(k1, (FEAT_PAD, in_channels), jnp.float32) * 0.1
    conv_b = jax.random.normal(k2, (FEAT_PAD, 1), jnp.float32) * 0.1
    # self.linear (nn.Linear(resnet.fc.in_features, word_dime)); columns >= WORD_DIME are
    # lane padding and are kept exactly zero (review correctness note).
    lin_w = jnp.zeros((FEAT_PAD, WORD_PAD), jnp.float32)
    lin_w = lin_w.at[:, :WORD_DIME].set(
        jax.random.normal(k3, (FEAT_PAD, WORD_DIME), jnp.float32) / (FEAT_PAD ** 0.5))
    lin_b = jnp.zeros((1, WORD_PAD), jnp.float32)
    lin_b = lin_b.at[:, :WORD_DIME].set(
        jax.random.normal(k4, (1, WORD_DIME), jnp.float32) * 0.05)
    return {
        # synthetic trunk (stand-in for frozen resnet152); MXU weights stored as bf16
        "conv_wt": conv_wt.astype(jnp.bfloat16),
        "conv_b": conv_b,
        "lin_w": lin_w.astype(jnp.bfloat16),
        "lin_b": lin_b,
        # self.bn (nn.BatchNorm1d(word_dime)): gamma=1, beta=0 at init
        "bn_gamma": jnp.ones((1, WORD_PAD), jnp.float32),
        "bn_beta": jnp.zeros((1, WORD_PAD), jnp.float32),
    }


if __name__ == "__main__":
    key = jax.random.PRNGKey(0)
    k_img, k_par = jax.random.split(key)

    B, C, H, W = 2, 4, 16, 16
    images = jax.random.normal(k_img, (B, C, H, W), jnp.float32)  # NCHW, like PyTorch
    params = init_params(k_par, C)

    out = jax.block_until_ready(encoder_cnn_forward(images, params))
    assert out.shape == (B, WORD_DIME) and out.dtype == jnp.float32
    assert bool(jnp.all(jnp.isfinite(out)))

    ref = jax.block_until_ready(encoder_cnn_reference(images, params))
    assert bool(jnp.allclose(out, ref, atol=1e-2, rtol=1e-2)), (
        "mismatch vs reference, max abs err "
        f"{float(jnp.max(jnp.abs(out - ref)))}")

    print("KERNEL_OK")
</pallas_src>

<mosaic_0001>
module attributes {stable_mosaic.version = 11 : i64} {
  func.func @trunk_kernel(%arg0: i32, %arg1: memref<2x4x256xf32, #tpu.memory_space<vmem>>, %arg2: memref<128x4xbf16, #tpu.memory_space<vmem>>, %arg3: memref<128x1xf32, #tpu.memory_space<vmem>>, %arg4: memref<2x128xbf16, #tpu.memory_space<vmem>>) attributes {dimension_semantics = [#tpu.dimension_semantics<parallel>], iteration_bounds = array<i64: 1>, scalar_prefetch = 0 : i64, scratch_operands = 0 : i64, tpu.core_type = #tpu.core_type<tc>, window_params = [{transform_indices = @transform_0, window_bounds = array<i64: 2, 4, 256>}, {pipeline_mode = #tpu.pipeline_mode<synchronous>, transform_indices = @transform_1, window_bounds = array<i64: 128, 4>}, {pipeline_mode = #tpu.pipeline_mode<synchronous>, transform_indices = @transform_2, window_bounds = array<i64: 128, 1>}, {transform_indices = @transform_3, window_bounds = array<i64: 2, 128>}]} {
    %c0 = arith.constant 0 : index
    %c0_0 = arith.constant 0 : index
    %0 = vector.load %arg2[%c0, %c0_0] : memref<128x4xbf16, #tpu.memory_space<vmem>>, vector<128x4xbf16>
    %c0_1 = arith.constant 0 : index
    %c0_2 = arith.constant 0 : index
    %1 = vector.load %arg3[%c0_1, %c0_2] : memref<128x1xf32, #tpu.memory_space<vmem>>, vector<128x1xf32>
    %2 = vector.shape_cast %1 : vector<128x1xf32> to vector<128x1xf32>
    %3 = vector.broadcast %2 : vector<128x1xf32> to vector<128x256xf32>
    %cst = arith.constant 1.000000e+00 : bf16
    %4 = vector.broadcast %cst : bf16 to vector<8x256xbf16>
    %c0_i32 = arith.constant 0 : i32
    %5 = arith.index_cast %c0_i32 : i32 to index
    %c0_3 = arith.constant 0 : index
    %c0_4 = arith.constant 0 : index
    %6 = vector.load %arg1[%5, %c0_3, %c0_4] : memref<2x4x256xf32, #tpu.memory_space<vmem>>, vector<1x4x256xf32>
    %7 = vector.shape_cast %6 : vector<1x4x256xf32> to vector<4x256xf32>
    %8 = arith.truncf %7 : vector<4x256xf32> to vector<4x256xbf16>
    %cst_5 = arith.constant dense<0.000000e+00> : vector<128x256xf32>
    %9 = tpu.matmul %0, %8, %cst_5 {dimension_numbers = #tpu.dot_dimension_numbers<[1], [0], [0], [1], [0, 0, 1, 1], [], []>} : vector<128x4xbf16>, vector<4x256xbf16>, vector<128x256xf32> -> vector<128x256xf32>
    %10 = arith.addf %9, %3 : vector<128x256xf32>
    %cst_6 = arith.constant 0.000000e+00 : f32
    %11 = vector.broadcast %cst_6 : f32 to vector<128x256xf32>
    %12 = arith.maximumf %10, %11 : vector<128x256xf32>
    %13 = arith.truncf %12 : vector<128x256xf32> to vector<128x256xbf16>
    %cst_7 = arith.constant dense<0.000000e+00> : vector<8x128xf32>
    %14 = tpu.matmul %4, %13, %cst_7 {dimension_numbers = #tpu.dot_dimension_numbers<[1], [1], [0], [0], [0, 0, 1, 0], [], []>} : vector<8x256xbf16>, vector<128x256xbf16>, vector<8x128xf32> -> vector<8x128xf32>
    %15 = vector.extract_strided_slice %14 {offsets = [0, 0], sizes = [1, 128], strides = [1, 1]} : vector<8x128xf32> to vector<1x128xf32>
    %cst_8 = arith.constant 3.906250e-03 : f32
    %16 = vector.broadcast %cst_8 : f32 to vector<1x128xf32>
    %17 = arith.mulf %15, %16 : vector<1x128xf32>
    %18 = arith.truncf %17 : vector<1x128xf32> to vector<1x128xbf16>
    %19 = arith.index_cast %c0_i32 : i32 to index
    %c0_9 = arith.constant 0 : index
    %20 = vector.load %arg4[%19, %c0_9] : memref<2x128xbf16, #tpu.memory_space<vmem>>, vector<1x128xbf16>
    tpu.vector_store %arg4[%19, %c0_9], %18 {strides = array<i32>} : memref<2x128xbf16, #tpu.memory_space<vmem>>, vector<1x128xbf16>,
    %c1_i32 = arith.constant 1 : i32
    %21 = arith.index_cast %c1_i32 : i32 to index
    %c0_10 = arith.constant 0 : index
    %c0_11 = arith.constant 0 : index
    %22 = vector.load %arg1[%21, %c0_10, %c0_11] : memref<2x4x256xf32, #tpu.memory_space<vmem>>, vector<1x4x256xf32>
    %23 = vector.shape_cast %22 : vector<1x4x256xf32> to vector<4x256xf32>
    %24 = arith.truncf %23 : vector<4x256xf32> to vector<4x256xbf16>
    %cst_12 = arith.constant dense<0.000000e+00> : vector<128x256xf32>
    %25 = tpu.matmul %0, %24, %cst_12 {dimension_numbers = #tpu.dot_dimension_numbers<[1], [0], [0], [1], [0, 0, 1, 1], [], []>} : vector<128x4xbf16>, vector<4x256xbf16>, vector<128x256xf32> -> vector<128x256xf32>
    %26 = arith.addf %25, %3 : vector<128x256xf32>
    %cst_13 = arith.constant 0.000000e+00 : f32
    %27 = vector.broadcast %cst_13 : f32 to vector<128x256xf32>
    %28 = arith.maximumf %26, %27 : vector<128x256xf32>
    %29 = arith.truncf %28 : vector<128x256xf32> to vector<128x256xbf16>
    %cst_14 = arith.constant dense<0.000000e+00> : vector<8x128xf32>
    %30 = tpu.matmul %4, %29, %cst_14 {dimension_numbers = #tpu.dot_dimension_numbers<[1], [1], [0], [0], [0, 0, 1, 0], [], []>} : vector<8x256xbf16>, vector<128x256xbf16>, vector<8x128xf32> -> vector<8x128xf32>
    %31 = vector.extract_strided_slice %30 {offsets = [0, 0], sizes = [1, 128], strides = [1, 1]} : vector<8x128xf32> to vector<1x128xf32>
    %cst_15 = arith.constant 3.906250e-03 : f32
    %32 = vector.broadcast %cst_15 : f32 to vector<1x128xf32>
    %33 = arith.mulf %31, %32 : vector<1x128xf32>
    %34 = arith.truncf %33 : vector<1x128xf32> to vector<1x128xbf16>
    %35 = arith.index_cast %c1_i32 : i32 to index
    %c0_16 = arith.constant 0 : index
    %36 = vector.load %arg4[%35, %c0_16] : memref<2x128xbf16, #tpu.memory_space<vmem>>, vector<1x128xbf16>
    tpu.vector_store %arg4[%35, %c0_16], %34 {strides = array<i32>} : memref<2x128xbf16, #tpu.memory_space<vmem>>, vector<1x128xbf16>,
    %c2_i32 = arith.constant 2 : i32
    return
  }
  func.func @transform_0(%arg0: i32) -> (i32, i32, i32) {
    %c0_i32 = arith.constant 0 : i32
    %c0_i32_0 = arith.constant 0 : i32
    %c0_i32_1 = arith.constant 0 : i32
    return %arg0, %c0_i32, %c0_i32_0 : i32, i32, i32
  }
  func.func @transform_1(%arg0: i32) -> (i32, i32) {
    %c0_i32 = arith.constant 0 : i32
    %c0_i32_0 = arith.constant 0 : i32
    %c0_i32_1 = arith.constant 0 : i32
    return %c0_i32, %c0_i32_0 : i32, i32
  }
  func.func @transform_2(%arg0: i32) -> (i32, i32) {
    %c0_i32 = arith.constant 0 : i32
    %c0_i32_0 = arith.constant 0 : i32
    %c0_i32_1 = arith.constant 0 : i32
    return %c0_i32, %c0_i32_0 : i32, i32
  }
  func.func @transform_3(%arg0: i32) -> (i32, i32) {
    %c0_i32 = arith.constant 0 : i32
    %c0_i32_0 = arith.constant 0 : i32
    return %arg0, %c0_i32 : i32, i32
  }
}

</mosaic_0001>

<bundles_post_ra>
// kernel: tpu_custom_call.1
= control target key start
LH: loop header
LB: loop body
LE: loop exit
PB: predicated region body
PF: predicated region fallthrough
CT: control target
= control target key end

     0   :  { %vm200_vm0 = vcmask 1041408   ;;  %v737_v3 = vmov 0   ;;  %vm175_vm1 = vcmask 31744   ;;  %s991_s0 = inlined_call_operand.vmem [shape: f32[2,4,256], index: 0, kind: input, shape index: {}]   ;;  %s992_s1 = inlined_call_operand.vmem [shape: bf16[128,4], index: 1, kind: input, shape index: {}]   ;;  %s993_s2 = inlined_call_operand.vmem [shape: f32[128,1], index: 2, kind: input, shape index: {}]   ;;  %s994_s3 = inlined_call_operand.hbm [shape: bf16[2,128], index: 3, kind: output, shape index: {}]  }
   0x1   :  { %v129_v0 = vld [vmem:[%s991_s0] sm:$0xff]  ;;  %239 = vmatprep.mubr.bf16.mxu0 %v737_v3  ;;  %v687_v4 = vld [vmem:[%s991_s0 + $0x8] sm:$0xff]  ;;  %701 = vset.pattern.permute.xlu0 %v737_v3  ;;  %v35_v14 = vld [vmem:[%s993_s2 + $0x10] sm:$0xff] }
   0x2   :  { %v131_v1 = vcombine.high %v129_v0, %v129_v0  ;;  %v133_v2 = vpack.c.bf16 %v129_v0, %v129_v0  ;;  %v419_v5 = vcombine.high %v687_v4, %v687_v4  ;;  %702 = vset.pattern.permute.xlu1 %v737_v3  ;;  %v421_v8 = vpack.c.bf16 %v687_v4, %v687_v4  ;;  %v704_v10 = vld [vmem:[%s992_s1] sm:$0xff]   ;;  %v34_v13 = vld [vmem:[%s993_s2 + $0x8] sm:$0xff]  ;;  %v36_v15 = vld [vmem:[%s993_s2 + $0x18] sm:$0xff] }
   0x3   :  { %v33_v12 = vld [vmem:[%s993_s2] sm:$0xff]  ;;  %61 = vperm.xlu1 %702, %v35_v14   ;;  %v706_v16 = vld [vmem:[%s992_s1 + $0x8] sm:$0xff]  }
   0x4   :  { %v134_v6 = vpack.c.bf16 %v131_v1, %v131_v1  ;;  %v202_v7 = vsel %vm200_vm0, %v133_v2, 0  ;;  %v422_v9 = vpack.c.bf16 %v419_v5, %v419_v5  ;;  %v424_v11 = vsel %vm200_vm0, %v421_v8, 0  ;;  %51 = vperm.xlu0 %701, %v33_v12   ;;  %v37_v17 = vld [vmem:[%s993_s2 + $0x20] sm:$0xff] }
   0x6   :  { %678 = vmatprep.subr.msk.bf16.mxu0 %vm200_vm0, %v134_v6 }
   0x7   :  { %208 = vmatpush1.bf16.msra.mxu0 %v202_v7 }
   0x8   :  { %688 = vmatprep.subr.msk.bf16.mxu0 %vm200_vm0, %v422_v9  ;;  %56 = vperm.xlu0 %701, %v34_v13  }
   0xa   :  { %679 = vmatmul.mubr.msk.bf16.vlgmr.msra.gmra.mrb[0].mxu0 %vm175_vm1, %v704_v10 }
   0xb   :  { %430 = vmatpush1.bf16.msra.mxu0 %v424_v11  ;;  %249 = vmatprep.mubr.bf16.mxu0 %v737_v3 }
   0xc   :  { %8 = vsyncpa [#allocation3], 0  ;;  %66 = vperm.xlu1 %702, %v36_v15   ;;  %71 = vperm.xlu0 %701, %v37_v17   ;;  %v38_v18 = vld [vmem:[%s993_s2 + $0x28] sm:$0xff]  ;;  %v39_v19 = vld [vmem:[%s993_s2 + $0x30] sm:$0xff]  ;;  %v738_v35 = vmov 1065369472  }
   0xd   :  { %v40_v20 = vld [vmem:[%s993_s2 + $0x38] sm:$0xff]  ;;  %v707_v21 = vld [vmem:[%s992_s1 + $0x10] sm:$0xff]   ;;  %v41_v22 = vld [vmem:[%s993_s2 + $0x40] sm:$0xff]  ;;  %400 = vmatprep.mubr.bf16.mxu1 %v738_v35  ;;  %vm410_vm2 = vcmask 1040384   ;;  %vm411_vm3 = vsmask.f32 256 }
   0xe   :  { %v42_v23 = vld [vmem:[%s993_s2 + $0x48] sm:$0xff]  ;;  %v43_v24 = vld [vmem:[%s993_s2 + $0x50] sm:$0xff]  ;;  %v44_v25 = vld [vmem:[%s993_s2 + $0x58] sm:$0xff]  ;;  %vm651_vm5 = vsmask.f32 7938 }
   0xf   :  { %v708_v26 = vld [vmem:[%s992_s1 + $0x18] sm:$0xff]   ;;  %v45_v27 = vld [vmem:[%s993_s2 + $0x60] sm:$0xff]  ;;  %v46_v28 = vld [vmem:[%s993_s2 + $0x68] sm:$0xff] }
  0x10   :  { %76 = vperm.xlu1 %702, %v38_v18   ;;  %81 = vperm.xlu0 %701, %v39_v19   ;;  %v47_v29 = vld [vmem:[%s993_s2 + $0x70] sm:$0xff]  ;;  %v48_v30 = vld [vmem:[%s993_s2 + $0x78] sm:$0xff]  ;;  %v709_v31 = vld [vmem:[%s992_s1 + $0x20] sm:$0xff]  }
  0x11   :  { %v710_v32 = vld [vmem:[%s992_s1 + $0x28] sm:$0xff]   ;;  %v711_v33 = vld [vmem:[%s992_s1 + $0x30] sm:$0xff]   ;;  %v712_v34 = vld [vmem:[%s992_s1 + $0x38] sm:$0xff]   ;;  %s740_s1 = smov [#allocation2]  }
  0x12   :  { %680 = vmatmul.mubr.msk.bf16.gmra.mrb[4].mxu0 %vm175_vm1, %v706_v16  ;;  %vm412_vm4 = vmand %vm410_vm2, %vm411_vm3  ;;  %s662_s7 = sshll.u32 %s740_s1, 4  ;;  %s663_s7 = int_to_ptr.vmem [resolvable:$true] %s662_s7 }
  0x13   :  { %259 = vmatprep.mubr.bf16.mxu0 %v737_v3  ;;  %vm652_vm6 = vmand %vm410_vm2, %vm651_vm5  ;;  %s713_s8 = scalar_lea.vmem %s663_s7, 16  ;;  %s717_s9 = scalar_lea.vmem %s663_s7, 32 }
  0x14   :  { %86 = vperm.xlu1 %702, %v40_v20   ;;  %91 = vperm.xlu0 %701, %v41_v22   ;;  %p714_p0 = scmp.ne.s32.totalorder %s663_s7, %s713_s8  ;;  %p718_p1 = scmp.lt.s32.totalorder %s663_s7, %s663_s7 }
  0x15   :  { %p719_p2 = scmp.lt.s32.totalorder %s717_s9, %s713_s8 }
  0x17   :  { %p720_p3 = por %p719_p2, %p718_p1 }
  0x18   :  { %96 = vperm.xlu1 %702, %v42_v23   ;;  %101 = vperm.xlu0 %701, %v43_v24  }
  0x19   :  { %p721_p4 = pnand %p720_p3, %p714_p0 }
  0x1a   :  { %681 = vmatmul.mubr.msk.bf16.gmra.mrb[8].mxu0 %vm175_vm1, %v707_v21 }
  0x1b   :  { %269 = vmatprep.mubr.bf16.mxu0 %v737_v3 }
  0x1c   :  { %106 = vperm.xlu1 %702, %v44_v25   ;;  %111 = vperm.xlu0 %701, %v45_v27  }
  0x20   :  { %116 = vperm.xlu1 %702, %v46_v28   ;;  %121 = vperm.xlu0 %701, %v47_v29  }
  0x22   :  { %682 = vmatmul.mubr.msk.bf16.gmra.mrb[12].mxu0 %vm175_vm1, %v708_v26 }
  0x23   :  { %279 = vmatprep.mubr.bf16.mxu0 %v737_v3 }
  0x24   :  { %126 = vperm.xlu1 %702, %v48_v30  }
  0x2a   :  { %683 = vmatmul.mubr.msk.bf16.gmra.mrb[16].mxu0 %vm175_vm1, %v709_v31 }
  0x2b   :  { %289 = vmatprep.mubr.bf16.mxu0 %v737_v3 }
  0x32   :  { %684 = vmatmul.mubr.msk.bf16.gmra.mrb[20].mxu0 %vm175_vm1, %v710_v32 }
  0x33   :  { %299 = vmatprep.mubr.bf16.mxu0 %v737_v3 }
  0x3a   :  { %685 = vmatmul.mubr.msk.bf16.gmra.mrb[24].mxu0 %vm175_vm1, %v711_v33 }
  0x3b   :  { %309 = vmatprep.mubr.bf16.mxu0 %v737_v3 }
  0x42   :  { %686 = vmatmul.mubr.msk.bf16.gmra.mrb[28].mxu0 %vm175_vm1, %v712_v34 }
  0x43   :  { %461 = vmatprep.mubr.bf16.mxu0 %v737_v3 }
  0x4a   :  { %689 = vmatmul.mubr.msk.bf16.vlgmr.msra.gmra.mrb[32].mxu0 %vm175_vm1, %v704_v10 }
  0x4b   :  { %471 = vmatprep.mubr.bf16.mxu0 %v737_v3 }
  0x52   :  { %690 = vmatmul.mubr.msk.bf16.gmra.mrb[36].mxu0 %vm175_vm1, %v706_v16 }
  0x53   :  { %481 = vmatprep.mubr.bf16.mxu0 %v737_v3 }
  0x5a   :  { %691 = vmatmul.mubr.msk.bf16.gmra.mrb[40].mxu0 %vm175_vm1, %v707_v21 }
  0x5b   :  { %491 = vmatprep.mubr.bf16.mxu0 %v737_v3 }
  0x62   :  { %692 = vmatmul.mubr.msk.bf16.gmra.mrb[44].mxu0 %vm175_vm1, %v708_v26 }
  0x63   :  { %501 = vmatprep.mubr.bf16.mxu0 %v737_v3 }
  0x6a   :  { %693 = vmatmul.mubr.msk.bf16.gmra.mrb[48].mxu0 %vm175_vm1, %v709_v31 }
  0x6b   :  { %511 = vmatprep.mubr.bf16.mxu0 %v737_v3 }
  0x72   :  { %694 = vmatmul.mubr.msk.bf16.gmra.mrb[52].mxu0 %vm175_vm1, %v710_v32 }
  0x73   :  { %521 = vmatprep.mubr.bf16.mxu0 %v737_v3 }
  0x7a   :  { %695 = vmatmul.mubr.msk.bf16.gmra.mrb[56].mxu0 %vm175_vm1, %v711_v33 }
  0x7b   :  { %531 = vmatprep.mubr.bf16.mxu0 %v737_v3 }
  0x82   :  { %696 = vmatmul.mubr.msk.bf16.gmra.mrb[60].mxu0 %vm175_vm1, %v712_v34  ;;  %v885_v45 = vpop.permute.xlu1 %61 }
  0x83   :  { %v878_v36 = vpop.permute.xlu0 %51 }
  0x87   :  { %v881_v40 = vpop.permute.xlu0 %56 }
  0x8b   :  { %v889_v56 = vpop.permute.xlu1 %66  ;;  %v894_v3 = vpop.permute.xlu0 %71 }
  0x8f   :  { %v897_v8 = vpop.permute.xlu1 %76  ;;  %v902_v19 = vpop.permute.xlu0 %81 }
  0x93   :  { %v905_v24 = vpop.permute.xlu1 %86 }
  0xdd   :  { %v241_v37 = vpop.f32.mrb[0].mxu0 }
  0xde   :  { %v242_v38 = vadd.f32 %v241_v37, %v878_v36  ;;  %v243_v39 = vpop.f32.mrb[1].mxu0  ;;  %v910_v37 = vpop.permute.xlu0 %91 }
  0xdf   :  { %v244_v41 = vadd.f32 %v243_v39, %v878_v36  ;;  %v245_v42 = vpop.f32.mrb[2].mxu0 }
  0xe0   :  { %v246_v43 = vadd.f32 %v245_v42, %v881_v40  ;;  %v247_v44 = vpop.f32.mrb[3].mxu0  ;;  %v320_v47 = vmax.f32 %v242_v38, 0.0 }
  0xe1   :  { %v248_v46 = vadd.f32 %v247_v44, %v881_v40  ;;  %v321_v49 = vmax.f32 %v244_v41, 0.0 }
  0xe2   :  { %v322_v48 = vmax.f32 %v246_v43, 0.0  ;;  %v913_v43 = vpop.permute.xlu1 %96 }
  0xe3   :  { %v323_v50 = vmax.f32 %v248_v46, 0.0 }
  0xe4   :  { %v352_v51 = vpack.c.bf16 %v322_v48, %v320_v47 }
  0xe5   :  { %v251_v52 = vpop.f32.mrb[4].mxu0  ;;  %v353_v53 = vpack.c.bf16 %v323_v50, %v321_v49 }
  0xe6   :  { %v252_v54 = vadd.f32 %v251_v52, %v885_v45  ;;  %v253_v55 = vpop.f32.mrb[5].mxu0 }
  0xe7   :  { %v254_v57 = vadd.f32 %v253_v55, %v885_v45  ;;  %v255_v58 = vpop.f32.mrb[6].mxu0  ;;  %368 = vmatprep.subr.bf16.mxu1 %v353_v53  ;;  %v918_v55 = vpop.permute.xlu0 %101 }
  0xe8   :  { %v256_v59 = vadd.f32 %v255_v58, %v889_v56  ;;  %v257_v60 = vpop.f32.mrb[7].mxu0  ;;  %369 = vmatpush1.bf16.xpose.msra.mxu1 %v352_v51  ;;  %v324_v62 = vmax.f32 %v252_v54, 0.0 }
  0xe9   :  { %v258_v61 = vadd.f32 %v257_v60, %v889_v56  ;;  %v325_v0 = vmax.f32 %v254_v57, 0.0 }
  0xea   :  { %v326_v63 = vmax.f32 %v256_v59, 0.0 }
  0xeb   :  { %v327_v1 = vmax.f32 %v258_v61, 0.0  ;;  %v921_v61 = vpop.permute.xlu1 %106 }
  0xec   :  { %v354_v2 = vpack.c.bf16 %v326_v63, %v324_v62 }
  0xed   :  { %v355_v4 = vpack.c.bf16 %v327_v1, %v325_v0  ;;  %v261_v5 = vpop.f32.mrb[8].mxu0 }
  0xee   :  { %v262_v6 = vadd.f32 %v261_v5, %v894_v3  ;;  %v263_v7 = vpop.f32.mrb[9].mxu0 }
  0xef   :  { %v264_v9 = vadd.f32 %v263_v7, %v894_v3  ;;  %v265_v10 = vpop.f32.mrb[10].mxu0  ;;  %370 = vmatprep.subr.bf16.mxu1 %v355_v4 }
  0xf0   :  { %v266_v11 = vadd.f32 %v265_v10, %v897_v8  ;;  %v267_v12 = vpop.f32.mrb[11].mxu0  ;;  %371 = vmatpush1.bf16.xpose.msra.mxu1 %v354_v2  ;;  %v328_v14 = vmax.f32 %v262_v6, 0.0  ;;  %v926_v10 = vpop.permute.xlu0 %111 }
  0xf1   :  { %v268_v13 = vadd.f32 %v267_v12, %v897_v8  ;;  %v329_v16 = vmax.f32 %v264_v9, 0.0 }
  0xf2   :  { %v330_v15 = vmax.f32 %v266_v11, 0.0 }
  0xf3   :  { %v331_v17 = vmax.f32 %v268_v13, 0.0 }
  0xf4   :  { %v356_v18 = vpack.c.bf16 %v330_v15, %v328_v14  ;;  %v929_v15 = vpop.permute.xlu1 %116 }
  0xf5   :  { %v357_v20 = vpack.c.bf16 %v331_v17, %v329_v16  ;;  %v271_v21 = vpop.f32.mrb[12].mxu0 }
  0xf6   :  { %v272_v22 = vadd.f32 %v271_v21, %v902_v19  ;;  %v273_v23 = vpop.f32.mrb[13].mxu0 }
  0xf7   :  { %v274_v25 = vadd.f32 %v273_v23, %v902_v19  ;;  %v275_v26 = vpop.f32.mrb[14].mxu0  ;;  %372 = vmatprep.subr.bf16.mxu1 %v357_v20 }
  0xf8   :  { %v276_v27 = vadd.f32 %v275_v26, %v905_v24  ;;  %v277_v28 = vpop.f32.mrb[15].mxu0  ;;  %373 = vmatpush1.bf16.xpose.msra.mxu1 %v356_v18  ;;  %v332_v30 = vmax.f32 %v272_v22, 0.0 }
  0xf9   :  { %v278_v29 = vadd.f32 %v277_v28, %v905_v24  ;;  %v333_v32 = vmax.f32 %v274_v25, 0.0  ;;  %v934_v28 = vpop.permute.xlu0 %121 }
  0xfa   :  { %v334_v31 = vmax.f32 %v276_v27, 0.0 }
  0xfb   :  { %v335_v33 = vmax.f32 %v278_v29, 0.0 }
  0xfc   :  { %v358_v34 = vpack.c.bf16 %v334_v31, %v332_v30 }
  0xfd   :  { %v359_v38 = vpack.c.bf16 %v335_v33, %v333_v32  ;;  %v281_v39 = vpop.f32.mrb[16].mxu0  ;;  %v937_v33 = vpop.permute.xlu1 %126 }
  0xfe   :  { %v282_v41 = vadd.f32 %v281_v39, %v910_v37  ;;  %v283_v42 = vpop.f32.mrb[17].mxu0 }
  0xff   :  { %v284_v44 = vadd.f32 %v283_v42, %v910_v37  ;;  %v285_v46 = vpop.f32.mrb[18].mxu0  ;;  %374 = vmatprep.subr.bf16.mxu1 %v359_v38 }
 0x100   :  { %v286_v47 = vadd.f32 %v285_v46, %v913_v43  ;;  %v287_v48 = vpop.f32.mrb[19].mxu0  ;;  %375 = vmatpush1.bf16.xpose.msra.mxu1 %v358_v34  ;;  %v336_v50 = vmax.f32 %v282_v41, 0.0 }
 0x101   :  { %v288_v49 = vadd.f32 %v287_v48, %v913_v43  ;;  %v337_v52 = vmax.f32 %v284_v44, 0.0 }
 0x102   :  { %v338_v51 = vmax.f32 %v286_v47, 0.0 }
 0x103   :  { %v339_v53 = vmax.f32 %v288_v49, 0.0 }
 0x104   :  { %v360_v54 = vpack.c.bf16 %v338_v51, %v336_v50 }
 0x105   :  { %v361_v57 = vpack.c.bf16 %v339_v53, %v337_v52  ;;  %v291_v58 = vpop.f32.mrb[20].mxu0 }
 0x106   :  { %v292_v59 = vadd.f32 %v291_v58, %v918_v55  ;;  %v293_v60 = vpop.f32.mrb[21].mxu0 }
 0x107   :  { %v294_v62 = vadd.f32 %v293_v60, %v918_v55  ;;  %v295_v63 = vpop.f32.mrb[22].mxu0  ;;  %376 = vmatprep.subr.bf16.mxu1 %v361_v57 }
 0x108   :  { %v296_v0 = vadd.f32 %v295_v63, %v921_v61  ;;  %v297_v1 = vpop.f32.mrb[23].mxu0  ;;  %377 = vmatpush1.bf16.xpose.msra.mxu1 %v360_v54  ;;  %v340_v4 = vmax.f32 %v292_v59, 0.0 }
 0x109   :  { %v298_v2 = vadd.f32 %v297_v1, %v921_v61  ;;  %v341_v6 = vmax.f32 %v294_v62, 0.0 }
 0x10a   :  { %v342_v5 = vmax.f32 %v296_v0, 0.0 }
 0x10b   :  { %v343_v7 = vmax.f32 %v298_v2, 0.0 }
 0x10c   :  { %v362_v9 = vpack.c.bf16 %v342_v5, %v340_v4 }
 0x10d   :  { %v363_v11 = vpack.c.bf16 %v343_v7, %v341_v6  ;;  %v301_v12 = vpop.f32.mrb[24].mxu0 }
 0x10e   :  { %v302_v13 = vadd.f32 %v301_v12, %v926_v10  ;;  %v303_v14 = vpop.f32.mrb[25].mxu0 }
 0x10f   :  { %v304_v16 = vadd.f32 %v303_v14, %v926_v10  ;;  %v305_v17 = vpop.f32.mrb[26].mxu0  ;;  %378 = vmatprep.subr.bf16.mxu1 %v363_v11 }
 0x110   :  { %v306_v18 = vadd.f32 %v305_v17, %v929_v15  ;;  %v307_v20 = vpop.f32.mrb[27].mxu0  ;;  %379 = vmatpush1.bf16.xpose.msra.mxu1 %v362_v9  ;;  %v344_v22 = vmax.f32 %v302_v13, 0.0 }
 0x111   :  { %v308_v21 = vadd.f32 %v307_v20, %v929_v15  ;;  %v345_v25 = vmax.f32 %v304_v16, 0.0 }
 0x112   :  { %v346_v23 = vmax.f32 %v306_v18, 0.0 }
 0x113   :  { %v347_v26 = vmax.f32 %v308_v21, 0.0 }
 0x114   :  { %v364_v27 = vpack.c.bf16 %v346_v23, %v344_v22 }
 0x115   :  { %v365_v29 = vpack.c.bf16 %v347_v26, %v345_v25  ;;  %v311_v30 = vpop.f32.mrb[28].mxu0 }
 0x116   :  { %v312_v31 = vadd.f32 %v311_v30, %v934_v28  ;;  %v313_v32 = vpop.f32.mrb[29].mxu0 }
 0x117   :  { %v314_v34 = vadd.f32 %v313_v32, %v934_v28  ;;  %v315_v38 = vpop.f32.mrb[30].mxu0  ;;  %380 = vmatprep.subr.bf16.mxu1 %v365_v29 }
 0x118   :  { %v316_v39 = vadd.f32 %v315_v38, %v937_v33  ;;  %v317_v41 = vpop.f32.mrb[31].mxu0  ;;  %381 = vmatpush1.bf16.xpose.msra.mxu1 %v364_v27  ;;  %v348_v44 = vmax.f32 %v312_v31, 0.0 }
 0x119   :  { %v318_v42 = vadd.f32 %v317_v41, %v937_v33  ;;  %v349_v47 = vmax.f32 %v314_v34, 0.0 }
 0x11a   :  { %v350_v46 = vmax.f32 %v316_v39, 0.0 }
 0x11b   :  { %v351_v48 = vmax.f32 %v318_v42, 0.0 }
 0x11c   :  { %v366_v49 = vpack.c.bf16 %v350_v46, %v348_v44 }
 0x11d   :  { %v367_v50 = vpack.c.bf16 %v351_v48, %v349_v47  ;;  %v463_v51 = vpop.f32.mrb[32].mxu0 }
 0x11e   :  { %v464_v52 = vadd.f32 %v463_v51, %v878_v36  ;;  %v465_v53 = vpop.f32.mrb[33].mxu0 }
 0x11f   :  { %v466_v54 = vadd.f32 %v465_v53, %v878_v36  ;;  %382 = vmatprep.subr.bf16.mxu1 %v367_v50  ;;  %v467_v57 = vpop.f32.mrb[34].mxu0 }
 0x120   :  { %v468_v58 = vadd.f32 %v467_v57, %v881_v40  ;;  %383 = vmatpush1.bf16.xpose.msra.mxu1 %v366_v49  ;;  %v469_v59 = vpop.f32.mrb[35].mxu0  ;;  %v542_v62 = vmax.f32 %v464_v52, 0.0 }
 0x121   :  { %v470_v60 = vadd.f32 %v469_v59, %v881_v40  ;;  %v543_v0 = vmax.f32 %v466_v54, 0.0 }
 0x122   :  { %v544_v63 = vmax.f32 %v468_v58, 0.0 }
 0x123   :  { %v545_v1 = vmax.f32 %v470_v60, 0.0 }
 0x124   :  { %v574_v2 = vpack.c.bf16 %v544_v63, %v542_v62 }
 0x125   :  { %v575_v4 = vpack.c.bf16 %v545_v1, %v543_v0  ;;  %v473_v5 = vpop.f32.mrb[36].mxu0 }
 0x126   :  { %v474_v6 = vadd.f32 %v473_v5, %v885_v45  ;;  %v475_v7 = vpop.f32.mrb[37].mxu0 }
 0x127   :  { %v476_v36 = vadd.f32 %v475_v7, %v885_v45  ;;  %401 = vmatmul.mubr.bf16.vlgmr.msra.gmra.mrb[0].mxu1 %v738_v35  ;;  %v477_v9 = vpop.f32.mrb[38].mxu0  ;;  %590 = vmatprep.subr.bf16.mxu1 %v575_v4 }
 0x128   :  { %v478_v11 = vadd.f32 %v477_v9, %v889_v56  ;;  %v479_v12 = vpop.f32.mrb[39].mxu0  ;;  %591 = vmatpush1.bf16.xpose.msra.mxu1 %v574_v2  ;;  %622 = vmatprep.mubr.bf16.mxu1 %v738_v35  ;;  %v546_v13 = vmax.f32 %v474_v6, 0.0 }
 0x129   :  { %v480_v40 = vadd.f32 %v479_v12, %v889_v56  ;;  %v547_v16 = vmax.f32 %v476_v36, 0.0 }
 0x12a   :  { %v548_v14 = vmax.f32 %v478_v11, 0.0 }
 0x12b   :  { %v549_v17 = vmax.f32 %v480_v40, 0.0 }
 0x12c   :  { %v576_v18 = vpack.c.bf16 %v548_v14, %v546_v13 }
 0x12d   :  { %v577_v20 = vpack.c.bf16 %v549_v17, %v547_v16  ;;  %v483_v21 = vpop.f32.mrb[40].mxu0 }
 0x12e   :  { %v484_v45 = vadd.f32 %v483_v21, %v894_v3  ;;  %v485_v22 = vpop.f32.mrb[41].mxu0 }
 0x12f   :  { %v486_v23 = vadd.f32 %v485_v22, %v894_v3  ;;  %v487_v25 = vpop.f32.mrb[42].mxu0  ;;  %592 = vmatprep.subr.bf16.mxu1 %v577_v20 }
 0x130   :  { %v488_v26 = vadd.f32 %v487_v25, %v897_v8  ;;  %v489_v27 = vpop.f32.mrb[43].mxu0  ;;  %593 = vmatpush1.bf16.xpose.msra.mxu1 %v576_v18  ;;  %v550_v29 = vmax.f32 %v484_v45, 0.0 }
 0x131   :  { %v490_v56 = vadd.f32 %v489_v27, %v897_v8  ;;  %v551_v31 = vmax.f32 %v486_v23, 0.0 }
 0x132   :  { %v552_v30 = vmax.f32 %v488_v26, 0.0 }
 0x133   :  { %v553_v32 = vmax.f32 %v490_v56, 0.0 }
 0x134   :  { %v578_v34 = vpack.c.bf16 %v552_v30, %v550_v29 }
 0x135   :  { %v579_v38 = vpack.c.bf16 %v553_v32, %v551_v31  ;;  %v493_v39 = vpop.f32.mrb[44].mxu0 }
 0x136   :  { %v494_v41 = vadd.f32 %v493_v39, %v902_v19  ;;  %v495_v42 = vpop.f32.mrb[45].mxu0 }
 0x137   :  { %v496_v3 = vadd.f32 %v495_v42, %v902_v19  ;;  %v497_v44 = vpop.f32.mrb[46].mxu0  ;;  %594 = vmatprep.subr.bf16.mxu1 %v579_v38 }
 0x138   :  { %v498_v46 = vadd.f32 %v497_v44, %v905_v24  ;;  %v499_v47 = vpop.f32.mrb[47].mxu0  ;;  %595 = vmatpush1.bf16.xpose.msra.mxu1 %v578_v34  ;;  %v554_v48 = vmax.f32 %v494_v41, 0.0 }
 0x139   :  { %v500_v8 = vadd.f32 %v499_v47, %v905_v24  ;;  %v555_v50 = vmax.f32 %v496_v3, 0.0 }
 0x13a   :  { %v556_v49 = vmax.f32 %v498_v46, 0.0 }
 0x13b   :  { %v557_v51 = vmax.f32 %v500_v8, 0.0 }
 0x13c   :  { %v580_v52 = vpack.c.bf16 %v556_v49, %v554_v48 }
 0x13d   :  { %v581_v53 = vpack.c.bf16 %v557_v51, %v555_v50  ;;  %v503_v54 = vpop.f32.mrb[48].mxu0  ;;  %v413_v51 = vld [vmem:[#allocation2] sm:$0x1] }
 0x13e   :  { %v504_v57 = vadd.f32 %v503_v54, %v910_v37  ;;  %v505_v58 = vpop.f32.mrb[49].mxu0 }
 0x13f   :  { %v506_v19 = vadd.f32 %v505_v58, %v910_v37  ;;  %v507_v59 = vpop.f32.mrb[50].mxu0  ;;  %596 = vmatprep.subr.bf16.mxu1 %v581_v53 }
 0x140   :  { %v508_v60 = vadd.f32 %v507_v59, %v913_v43  ;;  %v509_v62 = vpop.f32.mrb[51].mxu0  ;;  %597 = vmatpush1.bf16.xpose.msra.mxu1 %v580_v52  ;;  %v558_v63 = vmax.f32 %v504_v57, 0.0  ;;  %v739_v57 = vmov 1966171168  }
 0x141   :  { %v510_v24 = vadd.f32 %v509_v62, %v913_v43  ;;  %v559_v1 = vmax.f32 %v506_v19, 0.0  ;;  %v634_v58 = vunpack.c.l.s4 %v739_v57  ;;  %v636_v19 = vlaneseq }
 0x142   :  { %v560_v0 = vmax.f32 %v508_v60, 0.0 }
 0x143   :  { %v561_v2 = vmax.f32 %v510_v24, 0.0  ;;  %v635_v59 = vunpack.c.0.s8 %v634_v58  ;;  %v637_v60 = vshrl.u32 %v636_v19, 7 }
 0x144   :  { %v582_v4 = vpack.c.bf16 %v560_v0, %v558_v63 }
 0x145   :  { %v583_v5 = vpack.c.bf16 %v561_v2, %v559_v1  ;;  %v513_v6 = vpop.f32.mrb[52].mxu0  ;;  %v638_v24 = vsub.s32 %v635_v59, %v637_v60 }
 0x146   :  { %v514_v7 = vadd.f32 %v513_v6, %v918_v55  ;;  %v515_v36 = vpop.f32.mrb[53].mxu0 }
 0x147   :  { %v516_v37 = vadd.f32 %v515_v36, %v918_v55  ;;  %v517_v9 = vpop.f32.mrb[54].mxu0  ;;  %598 = vmatprep.subr.bf16.mxu1 %v583_v5 }
 0x148   :  { %v518_v11 = vadd.f32 %v517_v9, %v921_v61  ;;  %v519_v12 = vpop.f32.mrb[55].mxu0  ;;  %599 = vmatpush1.bf16.xpose.msra.mxu1 %v582_v4  ;;  %v562_v40 = vmax.f32 %v514_v7, 0.0 }
 0x149   :  { %v520_v43 = vadd.f32 %v519_v12, %v921_v61  ;;  %v563_v14 = vmax.f32 %v516_v37, 0.0 }
 0x14a   :  { %v564_v13 = vmax.f32 %v518_v11, 0.0 }
 0x14b   :  { %v565_v16 = vmax.f32 %v520_v43, 0.0 }
 0x14c   :  { %v584_v17 = vpack.c.bf16 %v564_v13, %v562_v40 }
 0x14d   :  { %v585_v18 = vpack.c.bf16 %v565_v16, %v563_v14  ;;  %v523_v20 = vpop.f32.mrb[56].mxu0 }
 0x14e   :  { %v524_v21 = vadd.f32 %v523_v20, %v926_v10  ;;  %v525_v45 = vpop.f32.mrb[57].mxu0 }
 0x14f   :  { %v526_v55 = vadd.f32 %v525_v45, %v926_v10  ;;  %v527_v22 = vpop.f32.mrb[58].mxu0  ;;  %600 = vmatprep.subr.bf16.mxu1 %v585_v18 }
 0x150   :  { %v528_v23 = vadd.f32 %v527_v22, %v929_v15  ;;  %v529_v25 = vpop.f32.mrb[59].mxu0  ;;  %601 = vmatpush1.bf16.xpose.msra.mxu1 %v584_v17  ;;  %v566_v26 = vmax.f32 %v524_v21, 0.0 }
 0x151   :  { %v530_v61 = vadd.f32 %v529_v25, %v929_v15  ;;  %v567_v56 = vmax.f32 %v526_v55, 0.0 }
 0x152   :  { %v568_v27 = vmax.f32 %v528_v23, 0.0 }
 0x153   :  { %v569_v29 = vmax.f32 %v530_v61, 0.0 }
 0x154   :  { %v586_v30 = vpack.c.bf16 %v568_v27, %v566_v26 }
 0x155   :  { %v587_v31 = vpack.c.bf16 %v569_v29, %v567_v56  ;;  %v533_v32 = vpop.f32.mrb[60].mxu0 }
 0x156   :  { %v534_v34 = vadd.f32 %v533_v32, %v934_v28  ;;  %v535_v38 = vpop.f32.mrb[61].mxu0 }
 0x157   :  { %v536_v10 = vadd.f32 %v535_v38, %v934_v28  ;;  %v537_v39 = vpop.f32.mrb[62].mxu0  ;;  %602 = vmatprep.subr.bf16.mxu1 %v587_v31 }
 0x158   :  { %v538_v41 = vadd.f32 %v537_v39, %v937_v33  ;;  %v539_v42 = vpop.f32.mrb[63].mxu0  ;;  %603 = vmatpush1.bf16.xpose.msra.mxu1 %v586_v30  ;;  %v570_v3 = vmax.f32 %v534_v34, 0.0 }
 0x159   :  { %v540_v15 = vadd.f32 %v539_v42, %v937_v33  ;;  %v571_v46 = vmax.f32 %v536_v10, 0.0 }
 0x15a   :  { %v572_v44 = vmax.f32 %v538_v41, 0.0 }
 0x15b   :  { %v573_v47 = vmax.f32 %v540_v15, 0.0 }
 0x15c   :  { %v588_v8 = vpack.c.bf16 %v572_v44, %v570_v3 }
 0x15d   :  { %v589_v48 = vpack.c.bf16 %v573_v47, %v571_v46 }
 0x15f   :  { %604 = vmatprep.subr.bf16.mxu1 %v589_v48 }
 0x160   :  { %605 = vmatpush1.bf16.xpose.msra.mxu1 %v588_v8 }
 0x167   :  { %623 = vmatmul.mubr.bf16.vlgmr.msra.gmra.mrb[4].mxu1 %v738_v35 }
 0x1fa   :  { %v402_v28 = vpop.f32.mrb[0].mxu1 }
 0x1fb   :  { %v408_v49 = vmul.f32 0.00390625, %v402_v28  ;;  %v404_v50 = vpop.f32.mrb[1].mxu1 }
 0x1fc   :  { %v405_v52 = vpop.f32.mrb[2].mxu1 }
 0x1fd   :  { %v409_v33 = vpack.c.bf16 %v408_v49, %v408_v49  ;;  %v406_v53 = vpop.f32.mrb[3].mxu1 }
 0x1ff   :  { %v414_v54 = vsel %vm412_vm4, %v409_v33, %v413_v51 }
 0x200   :  { %415 = vst [vmem:[#allocation2] sm:$0x1] %v414_v54 }
 0x207   :  { %v653_v7 = vld [vmem:[#allocation2] sm:$0x1] }
 0x23a   :  { %v624_v62 = vpop.f32.mrb[4].mxu1 }
 0x23b   :  { %v630_v35 = vmul.f32 0.00390625, %v624_v62  ;;  %v626_v63 = vpop.f32.mrb[5].mxu1 }
 0x23c   :  { %v627_v0 = vpop.f32.mrb[6].mxu1 }
 0x23d   :  { %v631_v1 = vpack.c.bf16 %v630_v35, %v630_v35  ;;  %v628_v2 = vpop.f32.mrb[7].mxu1 }
 0x23f   :  { %v639_v4 = vrot.slane %v631_v1, %v638_v24 }
 0x241   :  { %v646_v5 = vrot.slane %v639_v4, %v638_v24 }
 0x243   :  { %v648_v6 = vshll.u32 %v646_v5, 16 }
 0x245   :  { %v654_v36 = vsel %vm652_vm6, %v648_v6, %v653_v7 }
 0x246   :  { %655 = vst [vmem:[#allocation2] sm:$0x1] %v654_v36 }
 0x247   :  { %724 = shalt.err (!%p721_p4)
}
 0x248   :  { %s725_s12 = scalar_lea.hbm %s994_s3, 16 }
 0x249   :  { %p726_p5 = scmp.ne.s32.totalorder %s994_s3, %s725_s12  ;;  %p729_p6 = scmp.lt.u32.totalorder %s725_s12, %s994_s3 }
 0x24b   :  { %p731_p7 = pnand %p729_p6, %p726_p5 }
 0x24d   :  { %734 = shalt.err (!%p731_p7)
}
 0x24e   :  { %665 = dma.vmem_to_hbm [thread:$0]  %s663_s7, 16, %s994_s3, [#allocation3]  }
 0x24f   :  { %735 = dma.done.wait [#allocation3], 16  }
 0x250   :  { %736 = vsyncadd [#allocation3], 4294967280 }
 0x251   :  { %669 = vsyncpa [#allocation3], 1 }

</bundles_post_ra>
